<compile_context>
chip_gen: v7x
topology: tpu7x:2x2x1
jax: 0.10.0
libtpu: 0.0.40
codegen_flags: <defaults>
</compile_context>

<pallas_src>
import functools
import math

import jax
import jax.numpy as jnp
import numpy as np
from jax.experimental import pallas as pl
from jax.experimental.pallas import tpu as pltpu


# ----------------------------- kernels --------------------------------------


def _linear1_stats_kernel(x_ref, w1_ref, stats_ref, *, compute_dtype):
    """Phase 1 (stats only): per-tile column sum / sum-of-squares of h = x @ W1.

    No bias: under training-mode BatchNorm a per-column bias cancels exactly.
    The (bt, Hp) activation is NOT written back to HBM; phase 2 recomputes it
    (K is tiny, so the extra matmul FLOPs are negligible vs the saved bytes).
    """
    x = x_ref[...].astype(compute_dtype)
    h = jnp.dot(x, w1_ref[...], preferred_element_type=jnp.float32)  # (bt, Hp) f32
    s = jnp.sum(h, axis=0, keepdims=True)        # (1, Hp) column sum
    sq = jnp.sum(h * h, axis=0, keepdims=True)   # (1, Hp) column sum of squares
    # Pack both partials into one (1, 8, Hp) block: sublane 0 = sum,
    # sublane 1 = sumsq, remaining sublanes zero (single tiny output stream).
    row = jax.lax.broadcasted_iota(jnp.int32, (8, s.shape[-1]), 0)
    stats = jnp.where(row == 0, s, jnp.where(row == 1, sq, 0.0))
    stats_ref[...] = stats[None]


def _fused_fwd_kernel(x_ref, w1s_ref, w2_ref, vec_ref, o_ref, *, inv_h, eps,
                      compute_dtype):
    """Phase 2: (x @ W1s + shift) -> tanh-GELU -> Linear2 -> LayerNorm.

    BN scale is pre-folded into W1s, BN shift is row 0 of the packed vec input.
    vec rows: 0=shift, 1=b2, 2=ln_gamma, 3=ln_beta, 4=valid-lane mask.
    """
    shift = vec_ref[0:1, :]
    b2 = vec_ref[1:2, :]
    ln_g = vec_ref[2:3, :]
    ln_b = vec_ref[3:4, :]
    mask = vec_ref[4:5, :]

    x = x_ref[...].astype(compute_dtype)
    # Linear1 with folded BN affine (MXU, f32 accumulate).
    h = jnp.dot(x, w1s_ref[...], preferred_element_type=jnp.float32) + shift

    # GELU, tanh approximation (matches nn.GELU(approximate='tanh')); tanh -> EUP.
    c = 0.7978845608028654  # sqrt(2/pi)
    g = 0.5 * h * (1.0 + jnp.tanh(c * (h + 0.044715 * h * h * h)))

    # Linear 2 (MXU).
    z = jnp.dot(g.astype(compute_dtype), w2_ref[...],
                preferred_element_type=jnp.float32) + b2

    # LayerNorm over the REAL hidden columns (two-pass form for robustness).
    # Padded lanes of z are exactly 0 (zero-padded W2 columns and b2); the lane
    # mask keeps them at 0 after centering, so sums over Hp equal sums over H
    # and we divide by the real H (inv_h = 1/H).
    mu = jnp.sum(z, axis=-1, keepdims=True) * inv_h
    cent = (z - mu) * mask
    var = jnp.sum(cent * cent, axis=-1, keepdims=True) * inv_h
    y = cent * jax.lax.rsqrt(var + eps) * ln_g + ln_b
    o_ref[...] = y.astype(o_ref.dtype)


# ----------------------------- wrapper ---------------------------------------


def _round_up(a, m):
    return ((a + m - 1) // m) * m


def _pad_vec(v, hp):
    """1-D param (H,) -> (Hp,) float32, zero-padded along lanes."""
    v = jnp.asarray(v, jnp.float32).reshape(-1)
    return jnp.pad(v, (0, hp - v.shape[0]))


def _compiler_params(block_bytes):
    # Scoped-VMEM budget: double-buffered blocks + headroom, clamped so it is
    # valid on v5e/v6e (128 MiB phys) and v7x (64 MiB phys / 32 MiB scoped).
    limit = int(min(32 << 20, max(4 << 20, 6 * block_bytes)))
    return pltpu.CompilerParams(dimension_semantics=("parallel",),
                                vmem_limit_bytes=limit)


def representation_network_mlp(x, params, *, batch_tile=2048,
                               compute_dtype=jnp.float32,
                               out_dtype=jnp.float32, eps=1e-5, unpad=True):
    """x: (B, N) float32 observations.  params: dict (see init_params).

    Returns (B, H) if unpad=True (module contract); pass unpad=False to get the
    padded lane-dense (Bp, Hp) buffer and index lanes [:H] downstream (saves an
    extra XLA slice pass in a memory-bound pipeline).
    """
    B, K = x.shape
    H = int(params["w1"].shape[1])
    Hp = _round_up(max(H, 128), 128)                 # lane-dense hidden width
    cd_bytes = jnp.dtype(compute_dtype).itemsize
    out_bytes = jnp.dtype(out_dtype).itemsize

    # Tile selection: a (bt, Hp) f32 tile at Hp=128 is bt*512 bytes, so even
    # bt=2048 (1 MiB) double-buffered fits comfortably in every generation's
    # VMEM.  Cap bt at ceil(B/2) (rounded to 8) so nbt >= 2 whenever B allows
    # (keeps both v7x TensorCores busy; no-op on single-TC v5e/v6e).
    half = _round_up(pl.cdiv(B, 2), 8)
    bt = max(8, min(_round_up(batch_tile, 8), half))
    Bp = _round_up(B, bt)
    nbt = Bp // bt

    # ---- pack / zero-pad parameters (folded by jit; all tiny).
    #      b1 is intentionally NOT used: it cancels under training-mode BN.
    w1_f32 = jnp.pad(jnp.asarray(params["w1"], jnp.float32), ((0, 0), (0, Hp - H)))
    w2 = jnp.pad(jnp.asarray(params["w2"], compute_dtype),
                 ((0, Hp - H), (0, Hp - H)))
    b2 = _pad_vec(params["b2"], Hp)
    bn_g = _pad_vec(params["bn_gamma"], Hp)
    bn_b = _pad_vec(params["bn_beta"], Hp)
    ln_g = _pad_vec(params["ln_gamma"], Hp)
    ln_b = _pad_vec(params["ln_beta"], Hp)
    lane_mask = (jnp.arange(Hp) < H).astype(jnp.float32)

    xp = jnp.asarray(x, jnp.float32)
    if Bp != B:
        # Zero rows produce h == 0 (no bias), so they contribute 0 to BN sums;
        # the real batch size B is used as the divisor below.
        xp = jnp.pad(xp, ((0, Bp - B), (0, 0)))

    # ---- phase 1: per-tile BN statistics (no activation writeback) -----------
    w1_cd = w1_f32.astype(compute_dtype)
    p1_block_bytes = bt * K * 4 + K * Hp * cd_bytes + 8 * Hp * 4
    stats = pl.pallas_call(
        functools.partial(_linear1_stats_kernel, compute_dtype=compute_dtype),
        grid=(nbt,),
        in_specs=[pl.BlockSpec((bt, K), lambda i: (i, 0)),
                  pl.BlockSpec((K, Hp), lambda i: (0, 0))],        # resident weight
        out_specs=pl.BlockSpec((1, 8, Hp), lambda i: (i, 0, 0)),
        out_shape=jax.ShapeDtypeStruct((nbt, 8, Hp), jnp.float32),
        compiler_params=_compiler_params(p1_block_bytes),
        cost_estimate=pl.CostEstimate(
            flops=2 * Bp * K * Hp + 3 * Bp * Hp,
            transcendentals=0,
            bytes_accessed=Bp * K * 4 + K * Hp * cd_bytes + nbt * 8 * Hp * 4),
    )(xp, w1_cd)

    # ---- finish the full-batch BN reduction and fold the affine (tiny XLA ops).
    col_sum = jnp.sum(stats[:, 0, :], axis=0)         # (Hp,)
    col_sq = jnp.sum(stats[:, 1, :], axis=0)          # (Hp,)
    mu = col_sum / B                                  # divide by the REAL batch size
    var = jnp.maximum(col_sq / B - mu * mu, 0.0)
    scale = bn_g * jax.lax.rsqrt(var + eps)           # (Hp,)
    shift = bn_b - mu * scale                         # (Hp,)
    # Fold the BN scale into W1 so phase 2 does a single matmul + add.
    w1s = (w1_f32 * scale[None, :]).astype(compute_dtype)
    # Pack the per-column constants into one (8, Hp) input (4 DMA streams total).
    zeros = jnp.zeros((Hp,), jnp.float32)
    vecs = jnp.stack([shift, b2, ln_g, ln_b, lane_mask, zeros, zeros, zeros], 0)

    # ---- phase 2: Linear1(folded BN) + GELU + Linear2 + LayerNorm ------------
    p2_block_bytes = (bt * K * 4 + (K * Hp + Hp * Hp) * cd_bytes + 8 * Hp * 4
                      + bt * Hp * out_bytes)
    out = pl.pallas_call(
        functools.partial(_fused_fwd_kernel,
                          inv_h=1.0 / H, eps=eps, compute_dtype=compute_dtype),
        grid=(nbt,),
        in_specs=[pl.BlockSpec((bt, K), lambda i: (i, 0)),        # streamed x
                  pl.BlockSpec((K, Hp), lambda i: (0, 0)),        # resident W1s
                  pl.BlockSpec((Hp, Hp), lambda i: (0, 0)),       # resident W2
                  pl.BlockSpec((8, Hp), lambda i: (0, 0))],       # packed consts
        out_specs=pl.BlockSpec((bt, Hp), lambda i: (i, 0)),
        out_shape=jax.ShapeDtypeStruct((Bp, Hp), out_dtype),
        compiler_params=_compiler_params(p2_block_bytes),
        cost_estimate=pl.CostEstimate(
            flops=2 * Bp * K * Hp + 2 * Bp * Hp * Hp + 16 * Bp * Hp,
            transcendentals=Bp * Hp + Bp,
            bytes_accessed=Bp * K * 4 + (K * Hp + Hp * Hp) * cd_bytes
                           + 8 * Hp * 4 + Bp * Hp * out_bytes),
    )(xp, w1s, w2, vecs)

    if not unpad:
        return out            # lane-dense (Bp, Hp); real data in [:B, :H]
    return out[:B, :H]


# ----------------------------- reference & init -------------------------------


def _reference(x, p):
    """Pure-JAX reference (includes b1, which the kernel provably drops)."""
    h = x @ p["w1"] + p["b1"]
    mu = h.mean(0, keepdims=True)
    var = ((h - mu) ** 2).mean(0, keepdims=True)
    h = (h - mu) / jnp.sqrt(var + 1e-5) * p["bn_gamma"] + p["bn_beta"]
    c = math.sqrt(2.0 / math.pi)
    h = 0.5 * h * (1.0 + jnp.tanh(c * (h + 0.044715 * h ** 3)))
    z = h @ p["w2"] + p["b2"]
    mu2 = z.mean(-1, keepdims=True)
    var2 = ((z - mu2) ** 2).mean(-1, keepdims=True)
    return (z - mu2) / jnp.sqrt(var2 + 1e-5) * p["ln_gamma"] + p["ln_beta"]


def init_params(key, obs_dim, hidden):
    """Deterministic init mirroring PyTorch Linear's U(-1/sqrt(fan_in), +1/sqrt(fan_in))."""
    ks = jax.random.split(key, 8)
    bnd1 = 1.0 / math.sqrt(obs_dim)
    bnd2 = 1.0 / math.sqrt(hidden)
    return {
        "w1": jax.random.uniform(ks[0], (obs_dim, hidden), jnp.float32, -bnd1, bnd1),
        "b1": jax.random.uniform(ks[1], (hidden,), jnp.float32, -bnd1, bnd1),
        # BN / LN affines randomized (instead of 1/0 init) so the folded
        # scale/shift path is actually exercised by the correctness check.
        "bn_gamma": 1.0 + 0.1 * jax.random.normal(ks[2], (hidden,), jnp.float32),
        "bn_beta": 0.1 * jax.random.normal(ks[3], (hidden,), jnp.float32),
        # original module uses last_linear_layer_init_zero=True (all-zero); random
        # here so the kernel output is non-trivial.
        "w2": jax.random.uniform(ks[4], (hidden, hidden), jnp.float32, -bnd2, bnd2),
        "b2": jax.random.uniform(ks[5], (hidden,), jnp.float32, -bnd2, bnd2),
        "ln_gamma": 1.0 + 0.1 * jax.random.normal(ks[6], (hidden,), jnp.float32),
        "ln_beta": 0.1 * jax.random.normal(ks[7], (hidden,), jnp.float32),
    }


if __name__ == "__main__":
    B, OBS_DIM, HIDDEN = 32, 16, 64

    key = jax.random.PRNGKey(0)
    kx, kp = jax.random.split(key)
    x = jax.random.normal(kx, (B, OBS_DIM), dtype=jnp.float32)
    params = init_params(kp, OBS_DIM, HIDDEN)

    # Default batch_tile (2048) is capped to ceil(B/2)=16 here, so the grid has
    # 2 tiles -> the cross-tile (full-batch) BatchNorm statistics path is tested.
    fwd = jax.jit(representation_network_mlp)
    out = jax.block_until_ready(fwd(x, params))

    ref = _reference(x, params)
    np.testing.assert_allclose(np.asarray(out), np.asarray(ref), rtol=1e-4, atol=1e-4)
    assert out.shape == (B, HIDDEN)

    print("KERNEL_OK")
</pallas_src>

<mosaic_0001>
module attributes {stable_mosaic.version = 11 : i64} {
  func.func @_linear1_stats_kernel(%arg0: i32, %arg1: memref<16x16xf32, #tpu.memory_space<vmem>>, %arg2: memref<16x128xf32, #tpu.memory_space<vmem>>, %arg3: memref<1x8x128xf32, #tpu.memory_space<vmem>>) attributes {dimension_semantics = [#tpu.dimension_semantics<parallel>], iteration_bounds = array<i64: 2>, scalar_prefetch = 0 : i64, scratch_operands = 0 : i64, tpu.core_type = #tpu.core_type<tc>, window_params = [{transform_indices = @transform_0, window_bounds = array<i64: 16, 16>}, {pipeline_mode = #tpu.pipeline_mode<synchronous>, transform_indices = @transform_1, window_bounds = array<i64: 16, 128>}, {transform_indices = @transform_2, window_bounds = array<i64: 1, 8, 128>}]} {
    %c0 = arith.constant 0 : index
    %c0_0 = arith.constant 0 : index
    %0 = vector.load %arg1[%c0, %c0_0] : memref<16x16xf32, #tpu.memory_space<vmem>>, vector<16x16xf32>
    %c0_1 = arith.constant 0 : index
    %c0_2 = arith.constant 0 : index
    %1 = vector.load %arg2[%c0_1, %c0_2] : memref<16x128xf32, #tpu.memory_space<vmem>>, vector<16x128xf32>
    %cst = arith.constant dense<0.000000e+00> : vector<16x128xf32>
    %2 = tpu.matmul %0, %1, %cst {dimension_numbers = #tpu.dot_dimension_numbers<[1], [0], [0], [1], [0, 0, 1, 1], [], []>} : vector<16x16xf32>, vector<16x128xf32>, vector<16x128xf32> -> vector<16x128xf32>
    %cst_3 = arith.constant dense<0.000000e+00> : vector<128xf32>
    %3 = vector.multi_reduction <add>, %2, %cst_3 [0] : vector<16x128xf32> to vector<128xf32>
    %4 = vector.shape_cast %3 : vector<128xf32> to vector<1x128xf32>
    %5 = arith.mulf %2, %2 : vector<16x128xf32>
    %cst_4 = arith.constant dense<0.000000e+00> : vector<128xf32>
    %6 = vector.multi_reduction <add>, %5, %cst_4 [0] : vector<16x128xf32> to vector<128xf32>
    %7 = vector.shape_cast %6 : vector<128xf32> to vector<1x128xf32>
    %8 = tpu.iota {dimensions = array<i32: 0>} : vector<8x128xi32>
    %c0_i32 = arith.constant 0 : i32
    %9 = vector.broadcast %c0_i32 : i32 to vector<8x128xi32>
    %10 = arith.cmpi eq, %8, %9 : vector<8x128xi32>
    %c1_i32 = arith.constant 1 : i32
    %11 = vector.broadcast %c1_i32 : i32 to vector<8x128xi32>
    %12 = arith.cmpi eq, %8, %11 : vector<8x128xi32>
    %cst_5 = arith.constant 0.000000e+00 : f32
    %13 = vector.shape_cast %7 : vector<1x128xf32> to vector<1x128xf32>
    %14 = vector.broadcast %13 : vector<1x128xf32> to vector<8x128xf32>
    %15 = vector.broadcast %cst_5 : f32 to vector<8x128xf32>
    %16 = arith.select %12, %14, %15 : vector<8x128xi1>, vector<8x128xf32>
    %17 = vector.shape_cast %4 : vector<1x128xf32> to vector<1x128xf32>
    %18 = vector.broadcast %17 : vector<1x128xf32> to vector<8x128xf32>
    %19 = arith.select %10, %18, %16 : vector<8x128xi1>, vector<8x128xf32>
    %20 = vector.shape_cast %19 : vector<8x128xf32> to vector<1x8x128xf32>
    %c0_6 = arith.constant 0 : index
    %c0_7 = arith.constant 0 : index
    %c0_8 = arith.constant 0 : index
    %21 = vector.load %arg3[%c0_6, %c0_7, %c0_8] : memref<1x8x128xf32, #tpu.memory_space<vmem>>, vector<1x8x128xf32>
    tpu.vector_store %arg3[%c0_6, %c0_7, %c0_8], %20 {strides = array<i32>} : memref<1x8x128xf32, #tpu.memory_space<vmem>>, vector<1x8x128xf32>,
    return
  }
  func.func @transform_0(%arg0: i32) -> (i32, i32) {
    %c0_i32 = arith.constant 0 : i32
    %c0_i32_0 = arith.constant 0 : i32
    return %arg0, %c0_i32 : i32, i32
  }
  func.func @transform_1(%arg0: i32) -> (i32, i32) {
    %c0_i32 = arith.constant 0 : i32
    %c0_i32_0 = arith.constant 0 : i32
    %c0_i32_1 = arith.constant 0 : i32
    return %c0_i32, %c0_i32_0 : i32, i32
  }
  func.func @transform_2(%arg0: i32) -> (i32, i32, i32) {
    %c0_i32 = arith.constant 0 : i32
    %c0_i32_0 = arith.constant 0 : i32
    %c0_i32_1 = arith.constant 0 : i32
    return %arg0, %c0_i32, %c0_i32_0 : i32, i32, i32
  }
}

module attributes {stable_mosaic.version = 11 : i64} {
  func.func @_fused_fwd_kernel(%arg0: i32, %arg1: memref<16x16xf32, #tpu.memory_space<vmem>>, %arg2: memref<16x128xf32, #tpu.memory_space<vmem>>, %arg3: memref<128x128xf32, #tpu.memory_space<vmem>>, %arg4: memref<8x128xf32, #tpu.memory_space<vmem>>, %arg5: memref<16x128xf32, #tpu.memory_space<vmem>>) attributes {dimension_semantics = [#tpu.dimension_semantics<parallel>], iteration_bounds = array<i64: 2>, scalar_prefetch = 0 : i64, scratch_operands = 0 : i64, tpu.core_type = #tpu.core_type<tc>, window_params = [{transform_indices = @transform_0, window_bounds = array<i64: 16, 16>}, {pipeline_mode = #tpu.pipeline_mode<synchronous>, transform_indices = @transform_1, window_bounds = array<i64: 16, 128>}, {pipeline_mode = #tpu.pipeline_mode<synchronous>, transform_indices = @transform_2, window_bounds = array<i64: 128, 128>}, {pipeline_mode = #tpu.pipeline_mode<synchronous>, transform_indices = @transform_3, window_bounds = array<i64: 8, 128>}, {transform_indices = @transform_4, window_bounds = array<i64: 16, 128>}]} {
    %c0 = arith.constant 0 : index
    %c0_0 = arith.constant 0 : index
    %0 = vector.load %arg4[%c0, %c0_0] : memref<8x128xf32, #tpu.memory_space<vmem>>, vector<1x128xf32>
    %c1 = arith.constant 1 : index
    %c0_1 = arith.constant 0 : index
    %1 = vector.load %arg4[%c1, %c0_1] : memref<8x128xf32, #tpu.memory_space<vmem>>, vector<1x128xf32>
    %c2 = arith.constant 2 : index
    %c0_2 = arith.constant 0 : index
    %2 = vector.load %arg4[%c2, %c0_2] : memref<8x128xf32, #tpu.memory_space<vmem>>, vector<1x128xf32>
    %c3 = arith.constant 3 : index
    %c0_3 = arith.constant 0 : index
    %3 = vector.load %arg4[%c3, %c0_3] : memref<8x128xf32, #tpu.memory_space<vmem>>, vector<1x128xf32>
    %c4 = arith.constant 4 : index
    %c0_4 = arith.constant 0 : index
    %4 = vector.load %arg4[%c4, %c0_4] : memref<8x128xf32, #tpu.memory_space<vmem>>, vector<1x128xf32>
    %c0_5 = arith.constant 0 : index
    %c0_6 = arith.constant 0 : index
    %5 = vector.load %arg1[%c0_5, %c0_6] : memref<16x16xf32, #tpu.memory_space<vmem>>, vector<16x16xf32>
    %c0_7 = arith.constant 0 : index
    %c0_8 = arith.constant 0 : index
    %6 = vector.load %arg2[%c0_7, %c0_8] : memref<16x128xf32, #tpu.memory_space<vmem>>, vector<16x128xf32>
    %cst = arith.constant dense<0.000000e+00> : vector<16x128xf32>
    %7 = tpu.matmul %5, %6, %cst {dimension_numbers = #tpu.dot_dimension_numbers<[1], [0], [0], [1], [0, 0, 1, 1], [], []>} : vector<16x16xf32>, vector<16x128xf32>, vector<16x128xf32> -> vector<16x128xf32>
    %8 = vector.broadcast %0 : vector<1x128xf32> to vector<16x128xf32>
    %9 = arith.addf %7, %8 : vector<16x128xf32>
    %cst_9 = arith.constant 5.000000e-01 : f32
    %10 = vector.broadcast %cst_9 : f32 to vector<16x128xf32>
    %11 = arith.mulf %10, %9 : vector<16x128xf32>
    %cst_10 = arith.constant 4.471500e-02 : f32
    %12 = vector.broadcast %cst_10 : f32 to vector<16x128xf32>
    %13 = arith.mulf %12, %9 : vector<16x128xf32>
    %14 = arith.mulf %13, %9 : vector<16x128xf32>
    %15 = arith.mulf %14, %9 : vector<16x128xf32>
    %16 = arith.addf %9, %15 : vector<16x128xf32>
    %cst_11 = arith.constant 0.797884583 : f32
    %17 = vector.broadcast %cst_11 : f32 to vector<16x128xf32>
    %18 = arith.mulf %17, %16 : vector<16x128xf32>
    %19 = math.tanh %18 : vector<16x128xf32>
    %cst_12 = arith.constant 1.000000e+00 : f32
    %20 = vector.broadcast %cst_12 : f32 to vector<16x128xf32>
    %21 = arith.addf %20, %19 : vector<16x128xf32>
    %22 = arith.mulf %11, %21 : vector<16x128xf32>
    %c0_13 = arith.constant 0 : index
    %c0_14 = arith.constant 0 : index
    %23 = vector.load %arg3[%c0_13, %c0_14] : memref<128x128xf32, #tpu.memory_space<vmem>>, vector<128x128xf32>
    %cst_15 = arith.constant dense<0.000000e+00> : vector<16x128xf32>
    %24 = tpu.matmul %22, %23, %cst_15 {dimension_numbers = #tpu.dot_dimension_numbers<[1], [0], [0], [1], [0, 0, 1, 1], [], []>} : vector<16x128xf32>, vector<128x128xf32>, vector<16x128xf32> -> vector<16x128xf32>
    %25 = vector.broadcast %1 : vector<1x128xf32> to vector<16x128xf32>
    %26 = arith.addf %24, %25 : vector<16x128xf32>
    %cst_16 = arith.constant dense<0.000000e+00> : vector<16xf32>
    %27 = vector.multi_reduction <add>, %26, %cst_16 [1] : vector<16x128xf32> to vector<16xf32>
    %28 = vector.shape_cast %27 : vector<16xf32> to vector<16x1xf32>
    %cst_17 = arith.constant 1.562500e-02 : f32
    %29 = vector.broadcast %cst_17 : f32 to vector<16x1xf32>
    %30 = arith.mulf %28, %29 : vector<16x1xf32>
    %31 = vector.broadcast %30 : vector<16x1xf32> to vector<16x128xf32>
    %32 = arith.subf %26, %31 : vector<16x128xf32>
    %33 = vector.broadcast %4 : vector<1x128xf32> to vector<16x128xf32>
    %34 = arith.mulf %32, %33 : vector<16x128xf32>
    %35 = arith.mulf %34, %34 : vector<16x128xf32>
    %cst_18 = arith.constant dense<0.000000e+00> : vector<16xf32>
    %36 = vector.multi_reduction <add>, %35, %cst_18 [1] : vector<16x128xf32> to vector<16xf32>
    %37 = vector.shape_cast %36 : vector<16xf32> to vector<16x1xf32>
    %cst_19 = arith.constant 1.562500e-02 : f32
    %38 = vector.broadcast %cst_19 : f32 to vector<16x1xf32>
    %39 = arith.mulf %37, %38 : vector<16x1xf32>
    %cst_20 = arith.constant 9.99999974E-6 : f32
    %40 = vector.broadcast %cst_20 : f32 to vector<16x1xf32>
    %41 = arith.addf %39, %40 : vector<16x1xf32>
    %42 = math.rsqrt %41 : vector<16x1xf32>
    %43 = vector.broadcast %42 : vector<16x1xf32> to vector<16x128xf32>
    %44 = arith.mulf %34, %43 : vector<16x128xf32>
    %45 = vector.broadcast %2 : vector<1x128xf32> to vector<16x128xf32>
    %46 = arith.mulf %44, %45 : vector<16x128xf32>
    %47 = vector.broadcast %3 : vector<1x128xf32> to vector<16x128xf32>
    %48 = arith.addf %46, %47 : vector<16x128xf32>
    %c0_21 = arith.constant 0 : index
    %c0_22 = arith.constant 0 : index
    %49 = vector.load %arg5[%c0_21, %c0_22] : memref<16x128xf32, #tpu.memory_space<vmem>>, vector<16x128xf32>
    tpu.vector_store %arg5[%c0_21, %c0_22], %48 {strides = array<i32>} : memref<16x128xf32, #tpu.memory_space<vmem>>, vector<16x128xf32>,
    return
  }
  func.func @transform_0(%arg0: i32) -> (i32, i32) {
    %c0_i32 = arith.constant 0 : i32
    %c0_i32_0 = arith.constant 0 : i32
    return %arg0, %c0_i32 : i32, i32
  }
  func.func @transform_1(%arg0: i32) -> (i32, i32) {
    %c0_i32 = arith.constant 0 : i32
    %c0_i32_0 = arith.constant 0 : i32
    %c0_i32_1 = arith.constant 0 : i32
    return %c0_i32, %c0_i32_0 : i32, i32
  }
  func.func @transform_2(%arg0: i32) -> (i32, i32) {
    %c0_i32 = arith.constant 0 : i32
    %c0_i32_0 = arith.constant 0 : i32
    %c0_i32_1 = arith.constant 0 : i32
    return %c0_i32, %c0_i32_0 : i32, i32
  }
  func.func @transform_3(%arg0: i32) -> (i32, i32) {
    %c0_i32 = arith.constant 0 : i32
    %c0_i32_0 = arith.constant 0 : i32
    %c0_i32_1 = arith.constant 0 : i32
    return %c0_i32, %c0_i32_0 : i32, i32
  }
  func.func @transform_4(%arg0: i32) -> (i32, i32) {
    %c0_i32 = arith.constant 0 : i32
    %c0_i32_0 = arith.constant 0 : i32
    return %arg0, %c0_i32 : i32, i32
  }
}

</mosaic_0001>

<bundles_post_ra>
// kernel: representation_network_mlp.3
= control target key start
LH: loop header
LB: loop body
LE: loop exit
PB: predicated region body
PF: predicated region fallthrough
CT: control target
= control target key end

     0   :  { %9 = vsyncpa [#allocation3], 0  ;;  %s957_s0 = inlined_call_operand.vmem [shape: f32[32,16], index: 0, kind: input, shape index: {}]   ;;  %s958_s1 = inlined_call_operand.vmem [shape: f32[16,128], index: 1, kind: input, shape index: {}]   ;;  %s959_s2 = inlined_call_operand.vmem [shape: f32[128,128], index: 2, kind: input, shape index: {}]   ;;  %s960_s3 = inlined_call_operand.vmem [shape: f32[8,128], index: 3, kind: input, shape index: {}]   ;;  %s961_s4 = inlined_call_operand.hbm [shape: f32[32,128], index: 4, kind: output, shape index: {}]  }
   0x1   :  { %11 = vsyncpa [#allocation3 + $0x1], 0  ;;  %s786_s15 = smov 0   ;;  %s788_s16 = smov 0  }
   0x2   :  { %s790_s17 = smov 0   ;;  %s792_s18 = smov 0  }
   0x3 LB: > { %s807_s19 = sadd.s32 4294967295, %s756_s18   ;;  %s525_s20 = sadd.s32 4294967294, %s756_s18   ;;  %s756_s18 = sphi %s792_s18, %s967_s18   ;;  %s752_s17 = sphi %s790_s17, %s966_s17   ;;  %s748_s16 = sphi %s788_s16, %s965_s16   ;;  %s744_s15 = sphi %s786_s15, %s964_s15  }
   0x4   : > { %s811_s21 = sadd.s32 1, %s756_s18   ;;  %s113_s22 = sadd.s32 1, %s752_s17 }
   0x5   : > { %s110_s23 = ssub.s32 %s756_s18, %s811_s21  ;;  %p123_p0 = scmp.ne.s32.totalorder %s752_s17, %s748_s16 }
   0x6   : > { %p111_p1 = scmp.eq.s32.totalorder %s110_s23, 0  ;;  %p124_p2 = scmp.eq.s32.totalorder %s807_s19, 1 }
   0x7   : > { %p129_p3 = scmp.ne.s32.totalorder %s748_s16, %s744_s15  ;;  %p130_p4 = scmp.eq.s32.totalorder %s525_s20, 1 }
   0x8   : > { %s822_s24 = scalar_select %p111_p1, %s752_s17, %s113_s22  }
   0x9   : > { %p824_p5 = por %p124_p2, %p123_p0  ;;  %p828_p6 = por %p130_p4, %p129_p3 }
   0xa   : > { %p528_p7 = scmp.ge.s32.totalorder %s756_s18, 1  ;;  %p166_p8 = scmp.lt.s32.totalorder %s756_s18, 3 }
   0xc   : > { %p167_p9 = pnand %p528_p7, %p166_p8 }
   0xd   : > { %v206_v0 = vld [vmem:[%s958_s1] sm:$0xff] (!%p167_p9)  ;;  %v207_v1 = vld [vmem:[%s958_s1 + $0x8] sm:$0xff] (!%p167_p9)  ;;  %s530_s5 = sshll.u32 (!%p167_p9), %s807_s19, 1  ;;  %vm212_vm0 = vcmask (!%p167_p9), 130048   ;;  %v314_v8 = vld [vmem:[%s959_s2 + $0x10] sm:$0xff] (!%p167_p9)  ;;  %s189_s14 = sand.u32 (!%p167_p9), 1, %s748_s16  }
   0xe   : > { %170 = sbr.rel (%p167_p9) target bundleno = 814 (0x32e), region = 36  ;;  %v312_v2 = vld [vmem:[%s959_s2] sm:$0xff] (!%p167_p9)  ;;  %v609_v3 = vpack.c.bf16 (!%p167_p9), %v207_v1, %v206_v0  ;;  %p193_p10 = scmp.lt.s32.totalorder (!%p167_p9), %s530_s5, 3  ;;  %v313_v4 = vld [vmem:[%s959_s2 + $0x8] sm:$0xff] (!%p167_p9)  ;;  %v315_v9 = vld [vmem:[%s959_s2 + $0x18] sm:$0xff] (!%p167_p9) }
   0xf   : > { %v613_v5 = vpack.c.bf16 (!%p167_p9), %v313_v4, %v312_v2  ;;  %v617_v10 = vpack.c.bf16 (!%p167_p9), %v315_v9, %v314_v8  ;;  %v316_v11 = vld [vmem:[%s959_s2 + $0x20] sm:$0xff] (!%p167_p9)  ;;  %v317_v12 = vld [vmem:[%s959_s2 + $0x28] sm:$0xff] (!%p167_p9)  ;;  %v318_v14 = vld [vmem:[%s959_s2 + $0x30] sm:$0xff] (!%p167_p9)  ;;  %s529_s23 = sshll.u32 (!%p167_p9), %s189_s14, 4  ;;  %s544_s29 = sshll.u32 (!%p167_p9), %s807_s19, 8 }
  0x10   : > { %610 = vmatprep.subr.bf16.mxu0 (!%p167_p9), %v609_v3  ;;  %v621_v13 = vpack.c.bf16 (!%p167_p9), %v317_v12, %v316_v11  ;;  %v319_v15 = vld [vmem:[%s959_s2 + $0x38] sm:$0xff] (!%p167_p9)  ;;  %v320_v16 = vld [vmem:[%s959_s2 + $0x40] sm:$0xff] (!%p167_p9)  ;;  %v321_v18 = vld [vmem:[%s959_s2 + $0x48] sm:$0xff] (!%p167_p9)  ;;  %s191_s30 = scalar_lea.vmem (!%p167_p9), [#allocation2], %s529_s23  ;;  %s912_s8 = scalar_lea.hbm (!%p167_p9), %s961_s4, %s544_s29 }
  0x11   : > { %612 = vmatpush3.bf16.msra.mxu0 (!%p167_p9), %v609_v3  ;;  %614 = vmatprep.subr.bf16.mxu1 (!%p167_p9), %v613_v5  ;;  %v625_v17 = vpack.c.bf16 (!%p167_p9), %v319_v15, %v318_v14  ;;  %v629_v19 = vpack.c.bf16 (!%p167_p9), %v321_v18, %v320_v16  ;;  %v322_v20 = vld [vmem:[%s959_s2 + $0x50] sm:$0xff] (!%p167_p9)  ;;  %v323_v21 = vld [vmem:[%s959_s2 + $0x58] sm:$0xff] (!%p167_p9)  ;;  %v324_v23 = vld [vmem:[%s959_s2 + $0x60] sm:$0xff] (!%p167_p9)  ;;  %s916_s9 = scalar_lea.sflag (!%p167_p9), [#allocation3], %s189_s14  ;;  %s758_s19 = smov (!%p167_p9), [#allocation2]  }
  0x12   : > { %616 = vmatpush3.bf16.msra.mxu1 (!%p167_p9), %v613_v5  ;;  %v633_v22 = vpack.c.bf16 (!%p167_p9), %v323_v21, %v322_v20  ;;  %v325_v24 = vld [vmem:[%s959_s2 + $0x68] sm:$0xff] (!%p167_p9)  ;;  %v326_v26 = vld [vmem:[%s959_s2 + $0x70] sm:$0xff] (!%p167_p9)  ;;  %v327_v27 = vld [vmem:[%s959_s2 + $0x78] sm:$0xff] (!%p167_p9)  ;;  %s698_s11 = sshll.u32 (!%p167_p9), %s758_s19, 4  ;;  %s699_s11 = int_to_ptr.vmem [resolvable:$false] %s698_s11 }
  0x13   : > { %618 = vmatprep.subr.bf16.mxu1 (!%p167_p9), %v617_v10  ;;  %v637_v25 = vpack.c.bf16 (!%p167_p9), %v325_v24, %v324_v23  ;;  %v641_v28 = vpack.c.bf16 (!%p167_p9), %v327_v27, %v326_v26  ;;  %v532_v29 = vld [vmem:[%s960_s3] ss:$0 sm:$0xff] (!%p167_p9)  ;;  %v535_v52 = vld [vmem:[%s960_s3 + $0x1] ss:$0 sm:$0xff] (!%p167_p9)  ;;  %v536_v59 = vld [vmem:[%s960_s3 + $0x4] ss:$0 sm:$0xff] (!%p167_p9) }
  0x14   : > { %v537_v11 = vld [vmem:[%s960_s3 + $0x2] ss:$0 sm:$0xff] (!%p167_p9)  ;;  %s700_s12 = scalar_lea.vmem (!%p167_p9), %s699_s11, 512 }
  0x15   : > { %s969_s5 = smov (!%p193_p10, %s530_s5), 3 }
  0x16   : > { %s531_s10 = sshll.u32 %s969_s5, 3  ;;  %620 = vmatpush3.bf16.msra.mxu1 %v617_v10  ;;  %s463_s5 = sshll.u32 %s191_s30, 4  ;;  %s914_s5 = int_to_ptr.vmem [resolvable:$true] %s463_s5 }
  0x17   : > { %s196_s13 = scalar_lea.vmem %s957_s0, %s531_s10  ;;  %622 = vmatprep.subr.bf16.mxu1 %v621_v13  ;;  %s694_s10 = scalar_lea.vmem %s914_s5, 256 }
  0x18   : > { %v204_v6 = vld [vmem:[%s196_s13] sm:$0xff]  ;;  %v205_v7 = vld [vmem:[%s196_s13 + $0x8] sm:$0xff]  ;;  %p695_p11 = scmp.ne.s32.totalorder %s914_s5, %s694_s10  ;;  %p701_p0 = scmp.lt.s32.totalorder %s914_s5, %s699_s11 }
  0x19   : > { %571 = vmatprep.mubr.msk.f32.mxu0 %vm212_vm0, %v204_v6  ;;  %p702_p1 = scmp.lt.s32.totalorder %s700_s12, %s694_s10 }
  0x1a   : > { %572 = vmatmul.mubr.msk.f32.vlgmr.msra.gmra.mrb[0].mxu0 %vm212_vm0, %v205_v7  ;;  %624 = vmatpush3.bf16.msra.mxu1 %v621_v13  ;;  %v538_v13 = vld [vmem:[%s960_s3 + $0x3] ss:$0 sm:$0xff]  ;;  %p696_p12 = pnand %p695_p11, %p824_p5 }
  0x1b   : > { %626 = vmatprep.subr.bf16.mxu1 %v625_v17  ;;  %p703_p2 = por %p702_p1, %p701_p0 }
  0x1c   : > { %p697_p13 = pneg %p696_p12 }
  0x1e   : > { %628 = vmatpush3.bf16.msra.mxu1 %v625_v17  ;;  %p704_p3 = pnand %p703_p2, %p697_p13 }
  0x1f   : > { %630 = vmatprep.subr.bf16.mxu1 %v629_v19 }
  0x22   : > { %632 = vmatpush3.bf16.msra.mxu1 %v629_v19 }
  0x23   : > { %634 = vmatprep.subr.bf16.mxu1 %v633_v22 }
  0x26   : > { %636 = vmatpush3.bf16.msra.mxu1 %v633_v22 }
  0x27   : > { %638 = vmatprep.subr.bf16.mxu1 %v637_v25 }
  0x2a   : > { %640 = vmatpush3.bf16.msra.mxu1 %v637_v25 }
  0x2b   : > { %642 = vmatprep.subr.bf16.mxu1 %v641_v28 }
  0x2e   : > { %644 = vmatpush3.bf16.msra.mxu1 %v641_v28 }
  0xed   : > { %v573_v30 = vpop.f32.mrb[0].mxu0 }
  0xee   : > { %v291_v31 = vadd.f32 %v573_v30, %v532_v29  ;;  %v285_v32 = vpop.f32.mrb[1].mxu0 }
  0xef   : > { %v286_v33 = vadd.f32 %v532_v29, %v285_v32 }
  0xf0   : > { %v297_v34 = vmul.f32 0.044715, %v291_v31  ;;  %v295_v49 = vmul.f32 0.5, %v291_v31 }
  0xf1   : > { %v296_v35 = vmul.f32 0.044715, %v286_v33  ;;  %v294_v47 = vmul.f32 0.5, %v286_v33 }
  0xf2   : > { %v299_v36 = vmul.f32 %v297_v34, %v291_v31 }
  0xf3   : > { %v298_v37 = vmul.f32 %v296_v35, %v286_v33 }
  0xf4   : > { %v301_v38 = vmul.f32 %v299_v36, %v291_v31 }
  0xf5   : > { %v300_v39 = vmul.f32 %v298_v37, %v286_v33 }
  0xf6   : > { %v303_v40 = vadd.f32 %v301_v38, %v291_v31 }
  0xf7   : > { %v302_v41 = vadd.f32 %v300_v39, %v286_v33 }
  0xf8   : > { %v305_v42 = vmul.f32 0.7978846, %v303_v40 }
  0xf9   : > { %v304_v43 = vmul.f32 0.7978846, %v302_v41 }
  0xfa   : > { %686 = vtanh.f32 %v305_v42 }
  0xfb   : > { %688 = vtanh.f32 %v304_v43 }
 0x104   : > { %v687_v44 = vpop.eup %686 }
 0x105   : > { %v689_v45 = vpop.eup %688  ;;  %v309_v46 = vadd.f32 1.0, %v687_v44 }
 0x106   : > { %v308_v48 = vadd.f32 1.0, %v689_v45 }
 0x107   : > { %v311_v51 = vmul.f32 %v309_v46, %v295_v49 }
 0x108   : > { %v310_v50 = vmul.f32 %v308_v48, %v294_v47 }
 0x10a   : > { %606 = vmatprep.mubr.f32.mxu1 %v310_v50 }
 0x10b   : > { %607 = vmatmul.mubr.f32.vlgmr.msra.gmra.mrb[0].mxu1 %v311_v51 }
 0x1de   : > { %v608_v53 = vpop.f32.mrb[0].mxu1 }
 0x1df   : > { %v398_v54 = vpop.f32.mrb[1].mxu1  ;;  %v404_v56 = vadd.f32 %v608_v53, %v535_v52 }
 0x1e0   : > { %v399_v55 = vadd.f32 %v535_v52, %v398_v54 }
 0x1e2   : > { %407 = vadd.xlane.f32.xlu0 %v399_v55 }
 0x1e6   : > { %409 = vadd.xlane.f32.xlu0 %v404_v56 }
 0x26f   : > { %v408_v57 = vpop.xlane.xlu0 %407 }
 0x270   : > { %v411_v58 = vmul.f32 0.015625, %v408_v57 }
 0x272   : > { %v413_v60 = vsub.f32 %v399_v55, %v411_v58 }
 0x273   : > { %v410_v61 = vpop.xlane.xlu0 %409 }
 0x274   : > { %v412_v62 = vmul.f32 0.015625, %v410_v61  ;;  %v419_v63 = vmul.f32 %v536_v59, %v413_v60 }
 0x276   : > { %v414_v0 = vsub.f32 %v404_v56, %v412_v62  ;;  %v421_v1 = vmul.f32 %v419_v63, %v419_v63 }
 0x278   : > { %423 = vadd.xlane.f32.xlu1 %v421_v1  ;;  %v420_v2 = vmul.f32 %v536_v59, %v414_v0 }
 0x27a   : > { %v422_v3 = vmul.f32 %v420_v2, %v420_v2 }
 0x27c   : > { %425 = vadd.xlane.f32.xlu1 %v422_v3 }
 0x305   : > { %v424_v4 = vpop.xlane.xlu1 %423 }
 0x306   : > { %v427_v5 = vmul.f32 0.015625, %v424_v4 }
 0x308   : > { %v429_v6 = vadd.f32 1e-05, %v427_v5 }
 0x309   : > { %v426_v7 = vpop.xlane.xlu1 %425 }
 0x30a   : > { %690 = vrsqrt.f32 %v429_v6  ;;  %v428_v8 = vmul.f32 0.015625, %v426_v7 }
 0x30c   : > { %v430_v9 = vadd.f32 1e-05, %v428_v8 }
 0x30e   : > { %692 = vrsqrt.f32 %v430_v9 }
 0x314   : > { %v691_v10 = vpop.eup %690 }
 0x315   : > { %v433_v12 = vmul.f32 %v691_v10, %v419_v63 }
 0x317   : > { %v439_v14 = vmul.f32 %v537_v11, %v433_v12 }
 0x318   : > { %v693_v15 = vpop.eup %692 }
 0x319   : > { %v434_v16 = vmul.f32 %v693_v15, %v420_v2  ;;  %v445_v17 = vadd.f32 %v538_v13, %v439_v14 }
 0x31b   : > { %v440_v18 = vmul.f32 %v537_v11, %v434_v16  ;;  %447 = vst [vmem:[%s191_s30] sm:$0xff] %v445_v17 }
 0x31d   : > { %v446_v19 = vadd.f32 %v538_v13, %v440_v18 }
 0x31f   : > { %448 = vst [vmem:[%s191_s30 + $0x8] sm:$0xff] %v446_v19 }
 0x320   : > { %707 = shalt.err (!%p704_p3)
}
 0x321   : > { %s708_s13 = scalar_lea.hbm %s912_s8, 256  ;;  %s712_s22 = scalar_lea.hbm %s961_s4, 512 }
 0x322   : > { %p709_p4 = scmp.ne.s32.totalorder %s912_s8, %s708_s13  ;;  %p713_p9 = scmp.lt.u32.totalorder %s912_s8, %s961_s4 }
 0x323   : > { %p714_p10 = scmp.lt.u32.totalorder %s712_s22, %s708_s13  ;;  %p716_p12 = scmp.lt.u32.totalorder %s708_s13, %s912_s8 }
 0x324   : > { %p710_p7 = pnand %p709_p4, %p824_p5 }
 0x325   : > { %p715_p11 = por %p714_p10, %p713_p9 }
 0x326   : > { %p711_p8 = pneg %p710_p7 }
 0x327   : > { %p717_p13 = por %p716_p12, %p715_p11 }
 0x329   : > { %p718_p0 = pnand %p717_p13, %p711_p8 }
 0x32b   : > { %721 = shalt.err (!%p718_p0)
}
 0x32c   : > { %s759_s28 = smov 128   ;;  %s760_s29 = smov 8  }
 0x32d   : > { %645 = dma.vmem_to_hbm [thread:$0]  (%p824_p5), %s914_s5, 256, %s912_s8, %s916_s9, %s759_s28, %s759_s28, %s760_s29  }
 0x32e PF: > { %p651_p1 = scmp.ge.s32.totalorder %s756_s18, 2  ;;  %s478_s30 = sand.u32 1, %s744_s15  }
 0x32f   : > { %s479_s6 = scalar_lea.sflag [#allocation3], %s478_s30 }
 0x330   : > { %p648_p2 = pnand %p651_p1, %p828_p6 }
 0x332   : > { %739 = dma.done.wait (!%p648_p2), %s479_s6, 256  }
 0x333   : > { %741 = vsyncadd (!%p648_p2), %s479_s6, 4294967040  ;;  %p14_p3 = scmp.ge.s32.totalorder %s811_s21, 4   ;;  %s964_s15 = smov %s748_s16 }
 0x334   : > { %s965_s16 = smov %s752_s17  ;;  %s966_s17 = smov %s822_s24 }
 0x335   : > { %s967_s18 = smov %s811_s21  ;;  %16 = sbr.rel (!%p14_p3) target bundleno = 3 (0x3), region = 71 }
 0x33c   :  { %484 = vsyncpa [#allocation3], 1 }
 0x33d   :  { %486 = vsyncpa [#allocation3 + $0x1], 1 }

// kernel: representation_network_mlp.2
= control target key start
LH: loop header
LB: loop body
LE: loop exit
PB: predicated region body
PF: predicated region fallthrough
CT: control target
= control target key end

     0   :  { %s364_s9 = smov 0   ;;  %s392_s0 = inlined_call_operand.vmem [shape: f32[32,16], index: 0, kind: input, shape index: {}]   ;;  %s393_s1 = inlined_call_operand.vmem [shape: f32[16,128], index: 1, kind: input, shape index: {}]   ;;  %s394_s2 = inlined_call_operand.vmem [shape: f32[2,8,128], index: 2, kind: output, shape index: {}]  }
   0x1 LB: > { %s370_s10 = sadd.s32 4294967295, %s347_s9   ;;  %p310_p0 = scmp.ge.s32.totalorder %s347_s9, 1  ;;  %s347_s9 = sphi %s364_s9, %s12_s9  }
   0x2   : > { %p113_p1 = scmp.lt.s32.totalorder %s347_s9, 3 }
   0x4   : > { %p114_p2 = pnand %p310_p0, %p113_p1 }
   0x5   : > { %v146_v0 = vld [vmem:[%s393_s1] sm:$0xff] (!%p114_p2)  ;;  %v147_v1 = vld [vmem:[%s393_s1 + $0x8] sm:$0xff] (!%p114_p2)  ;;  %s311_s15 = sshll.u32 (!%p114_p2), %s370_s10, 1  ;;  %vm148_vm0 = vcmask (!%p114_p2), 130048   ;;  %p140_p4 = scmp.lt.s32.totalorder (!%p114_p2), %s370_s10, 1  ;;  %v246_v14 = vlaneseq (!%p114_p2) }
   0x6   : > { %117 = sbr.rel (%p114_p2) target bundleno = 250 (0xfa), region = 28  ;;  %v329_v2 = vpack.c.bf16 (!%p114_p2), %v147_v1, %v146_v0  ;;  %p135_p3 = scmp.lt.s32.totalorder (!%p114_p2), %s311_s15, 3 }
   0x7   : > { %v247_v19 = vshrl.u32 (!%p114_p2), %v246_v14, 7 }
   0x8   : > { %330 = vmatprep.subr.bf16.mxu0 (!%p114_p2), %v329_v2 }
   0x9   : > { %332 = vmatpush3.bf16.msra.mxu0 (!%p114_p2), %v329_v2  ;;  %vm249_vm1 = vcmp.eq.s32.totalorder (!%p114_p2), %v247_v19, 1  ;;  %vm248_vm2 = vcmp.eq.s32.totalorder (!%p114_p2), %v247_v19, 0 }
   0xd   : > { %s396_s15 = smov (!%p135_p3, %s311_s15), 3  ;;  %s398_s10 = smov (!%p140_p4, %s370_s10), 1 }
   0xe   : > { %s312_s16 = sshll.u32 %s396_s15, 3  ;;  %s313_s20 = sshll.u32 %s398_s10, 3 }
   0xf   : > { %s138_s19 = scalar_lea.vmem %s392_s0, %s312_s16  ;;  %s143_s23 = scalar_lea.vmem %s394_s2, %s313_s20 }
  0x10   : > { %v144_v3 = vld [vmem:[%s138_s19] sm:$0xff]  ;;  %v145_v4 = vld [vmem:[%s138_s19 + $0x8] sm:$0xff] }
  0x11   : > { %326 = vmatprep.mubr.msk.f32.mxu0 %vm148_vm0, %v144_v3 }
  0x12   : > { %327 = vmatmul.mubr.msk.f32.vlgmr.msra.gmra.mrb[0].mxu0 %vm148_vm0, %v145_v4 }
  0xe5   : > { %v328_v5 = vpop.f32.mrb[0].mxu0 }
  0xe6   : > { %v238_v6 = vmul.f32 %v328_v5, %v328_v5  ;;  %v221_v7 = vpop.f32.mrb[1].mxu0 }
  0xe7   : > { %v230_v8 = vadd.f32 %v328_v5, %v221_v7  ;;  %v237_v9 = vmul.f32 %v221_v7, %v221_v7 }
  0xe9   : > { %v231_v10 = vrot.slane %v230_v8, 4  ;;  %v239_v11 = vadd.f32 %v238_v6, %v237_v9 }
  0xeb   : > { %v232_v12 = vadd.f32 %v231_v10, %v230_v8  ;;  %v240_v13 = vrot.slane %v239_v11, 4 }
  0xed   : > { %v233_v15 = vrot.slane %v232_v12, 2  ;;  %v241_v16 = vadd.f32 %v240_v13, %v239_v11 }
  0xef   : > { %v234_v17 = vadd.f32 %v233_v15, %v232_v12  ;;  %v242_v18 = vrot.slane %v241_v16, 2 }
  0xf1   : > { %v243_v20 = vadd.f32 %v242_v18, %v241_v16  ;;  %v235_v21 = vrot.slane %v234_v17, 1 }
  0xf3   : > { %v244_v22 = vrot.slane %v243_v20, 1  ;;  %v236_v24 = vadd.f32 %v235_v21, %v234_v17 }
  0xf5   : > { %v245_v23 = vadd.f32 %v244_v22, %v243_v20 }
  0xf7   : > { %v250_v25 = vsel %vm249_vm1, %v245_v23, 0.0 }
  0xf8   : > { %v251_v26 = vsel %vm248_vm2, %v236_v24, %v250_v25 }
  0xf9   : > { %252 = vst [vmem:[%s143_s23] sm:$0xff] %v251_v26 }
  0xfa PF: > { %s12_s9 = sadd.s32 1, %s347_s9  }
  0xfb   : > { %p9_p5 = scmp.ge.s32.totalorder %s12_s9, 4  }
  0xfd   :  { %11 = sbr.rel (!%p9_p5) target bundleno = 1 (0x1), region = 58 }

</bundles_post_ra>
